<compile_context>
chip_gen: v7x
topology: tpu7x:2x2x1
jax: 0.10.0
libtpu: 0.0.40
codegen_flags: <defaults>
</compile_context>

<pallas_src>
import functools

import jax
import jax.numpy as jnp
from jax.experimental import pallas as pl
from jax.experimental.pallas import tpu as pltpu

EPS = 1e-5  # PyTorch nn.LayerNorm default


def _round_up(v, m):
    return ((v + m - 1) // m) * m


def _prenorm_kernel(x_ref, gamma_ref, beta_ref, w_ref, b_ref, o_ref, *,
                    c_real, mxu_dtype):
    # x_ref: (TR, Cp); gamma/beta: (1, Cp); w: (Cp, TH); b: (1, TH); o: (TR, TH)
    x = x_ref[...].astype(jnp.float32)

    # --- LayerNorm over the channel axis, one-pass statistics -------------
    # Channel padding is zero, so sums over the padded axis equal sums over
    # the real channels; divide by the *real* channel count (biased variance,
    # matching PyTorch nn.LayerNorm).
    inv_c = 1.0 / float(c_real)
    s = jnp.sum(x, axis=-1, keepdims=True)
    sq = jnp.sum(x * x, axis=-1, keepdims=True)
    mean = s * inv_c
    var = jnp.maximum(sq * inv_c - mean * mean, 0.0)
    inv = jax.lax.rsqrt(var + EPS)

    # Affine normalize in f32 (padded channels have gamma == beta == 0, so
    # they normalize to exactly 0 and contribute nothing to the matmul).
    normed = (x - mean) * inv * gamma_ref[...].astype(jnp.float32) \
        + beta_ref[...].astype(jnp.float32)

    # --- fn = Linear(C -> H), fused ----------------------------------------
    # MXU inputs in `mxu_dtype` (bf16 on v6e/v7x fast path), f32 accumulation.
    y = jnp.dot(normed.astype(mxu_dtype), w_ref[...].astype(mxu_dtype),
                preferred_element_type=jnp.float32)
    y = y + b_ref[...].astype(jnp.float32)
    o_ref[...] = y.astype(o_ref.dtype)


def prenorm_forward(x, gamma, beta, w, b, *,
                    tile_rows=None, tile_h=None,
                    mxu_dtype=jnp.bfloat16,
                    vmem_budget_bytes=44 * 1024 * 1024):
    """Fused LayerNorm(C) + Linear(C, H):  x (B, N, C) -> (B, N, H)."""
    B, N, C = x.shape
    H = w.shape[1]
    R = B * N

    # Lane-dense channel padding (last dims multiples of 128).
    Cp = _round_up(C, 128)
    Hp = _round_up(H, 128)

    # Row tile: multiple of 8 (f32 sublanes); sweep-backed default of 512.
    if tile_rows is None:
        tile_rows = min(512, _round_up(R, 8))
    tile_rows = max(8, _round_up(int(tile_rows), 8))
    # H tile: multiple of 128, keeps the weight slab out of VMEM all at once.
    if tile_h is None:
        tile_h = min(512, Hp)
    tile_h = max(128, min(_round_up(int(tile_h), 128), Hp))

    x_item = jnp.dtype(x.dtype).itemsize
    w_item = jnp.dtype(w.dtype).itemsize

    def _est_vmem(tr, th):
        # Default BlockSpec pipelining double-buffers every operand.
        xb = tr * Cp * x_item          # x tile
        ob = tr * th * x_item          # output tile
        wb = Cp * th * w_item          # weight tile (grid-invariant over rows)
        pb = (2 * Cp + th) * w_item    # gamma, beta, bias
        return 2 * (xb + ob + wb + pb)

    # Shrink tiles until the double-buffered footprint fits the budget
    # (44 MiB leaves headroom under v7x's 64 MiB VMEM).
    while tile_rows > 8 and _est_vmem(tile_rows, tile_h) > vmem_budget_bytes:
        tile_rows = max(8, _round_up(tile_rows // 2, 8))
    while tile_h > 128 and _est_vmem(tile_rows, tile_h) > vmem_budget_bytes:
        tile_h = max(128, _round_up(tile_h // 2, 128))

    # Pad the problem up to tile multiples (no divisibility asserts).
    Rp = _round_up(R, tile_rows)
    Hp = _round_up(Hp, tile_h)

    x2 = jnp.pad(x.reshape(R, C), ((0, Rp - R), (0, Cp - C)))
    gamma2 = jnp.pad(gamma.reshape(1, C), ((0, 0), (0, Cp - C)))
    beta2 = jnp.pad(beta.reshape(1, C), ((0, 0), (0, Cp - C)))
    w2 = jnp.pad(w, ((0, Cp - C), (0, Hp - H)))
    b2 = jnp.pad(b.reshape(1, H), ((0, 0), (0, Hp - H)))

    grid = (Rp // tile_rows, Hp // tile_h)

    cost = pl.CostEstimate(
        flops=2 * Rp * Cp * Hp + 8 * Rp * Cp,
        transcendentals=Rp,
        bytes_accessed=(Rp * Cp + Rp * Hp) * x_item
        + (Cp * Hp + 2 * Cp + Hp) * w_item,
    )

    kernel = functools.partial(_prenorm_kernel, c_real=C, mxu_dtype=mxu_dtype)

    out = pl.pallas_call(
        kernel,
        out_shape=jax.ShapeDtypeStruct((Rp, Hp), x.dtype),
        grid_spec=pltpu.PrefetchScalarGridSpec(
            num_scalar_prefetch=0,
            grid=grid,
            in_specs=[
                pl.BlockSpec((tile_rows, Cp), lambda i, j: (i, 0)),
                pl.BlockSpec((1, Cp), lambda i, j: (0, 0)),
                pl.BlockSpec((1, Cp), lambda i, j: (0, 0)),
                pl.BlockSpec((Cp, tile_h), lambda i, j: (0, j)),
                pl.BlockSpec((1, tile_h), lambda i, j: (0, j)),
            ],
            out_specs=pl.BlockSpec((tile_rows, tile_h), lambda i, j: (i, j)),
        ),
        compiler_params=pltpu.CompilerParams(
            dimension_semantics=("parallel", "parallel"),
            vmem_limit_bytes=56 * 1024 * 1024,
        ),
        cost_estimate=cost,
    )(x2, gamma2, beta2, w2, b2)

    return out[:R, :H].reshape(B, N, H)


def prenorm_reference(x, gamma, beta, w, b):
    x = x.astype(jnp.float32)
    mean = jnp.mean(x, axis=-1, keepdims=True)
    var = jnp.mean((x - mean) ** 2, axis=-1, keepdims=True)
    normed = (x - mean) * jax.lax.rsqrt(var + EPS) * gamma + beta
    return jnp.einsum("bnc,ch->bnh", normed, w) + b


if __name__ == "__main__":
    key = jax.random.PRNGKey(0)
    # Ragged on purpose: exercises row padding (200 -> 256 with tile 128),
    # channel padding (32 -> 128) and H padding (48 -> 128).
    B, N, C, H = 2, 100, 32, 48

    k1, k2, k3 = jax.random.split(key, 3)
    x = jax.random.normal(k1, (B, N, C), dtype=jnp.float32)

    # Deterministic parameter init (synthetic, not a checkpoint load).
    gamma = jnp.ones((C,), dtype=jnp.float32)          # LayerNorm weight
    beta = jnp.zeros((C,), dtype=jnp.float32)          # LayerNorm bias
    w = jax.random.normal(k2, (C, H), dtype=jnp.float32) * 0.02  # fn = Linear(C,H)
    b = jax.random.normal(k3, (H,), dtype=jnp.float32) * 0.01

    ref = prenorm_reference(x, gamma, beta, w, b)

    # f32 MXU path: tight numerical check of the fused LayerNorm + Linear.
    out_f32 = prenorm_forward(x, gamma, beta, w, b, tile_rows=128,
                              mxu_dtype=jnp.float32)
    out_f32 = jax.block_until_ready(out_f32)
    assert out_f32.shape == (B, N, H)
    assert jnp.allclose(out_f32, ref, atol=1e-4, rtol=1e-4)

    # bf16-input MXU path (v6e/v7x fast path), f32 accumulation, f32 stats.
    out_bf16 = prenorm_forward(x, gamma, beta, w, b, tile_rows=128,
                               mxu_dtype=jnp.bfloat16)
    out_bf16 = jax.block_until_ready(out_bf16)
    assert out_bf16.shape == (B, N, H)
    assert jnp.allclose(out_bf16, ref, atol=2e-2, rtol=2e-2)

    print("KERNEL_OK")
</pallas_src>

<mosaic_0001>
module attributes {stable_mosaic.version = 11 : i64} {
  func.func @_prenorm_kernel(%arg0: i32, %arg1: i32, %arg2: memref<128x128xf32, #tpu.memory_space<vmem>>, %arg3: memref<1x128xf32, #tpu.memory_space<vmem>>, %arg4: memref<1x128xf32, #tpu.memory_space<vmem>>, %arg5: memref<128x128xf32, #tpu.memory_space<vmem>>, %arg6: memref<1x128xf32, #tpu.memory_space<vmem>>, %arg7: memref<128x128xf32, #tpu.memory_space<vmem>>) attributes {dimension_semantics = [#tpu.dimension_semantics<parallel>, #tpu.dimension_semantics<parallel>], iteration_bounds = array<i64: 2, 1>, scalar_prefetch = 0 : i64, scratch_operands = 0 : i64, tpu.core_type = #tpu.core_type<tc>, window_params = [{transform_indices = @transform_0, window_bounds = array<i64: 128, 128>}, {pipeline_mode = #tpu.pipeline_mode<synchronous>, transform_indices = @transform_1, window_bounds = array<i64: 1, 128>}, {pipeline_mode = #tpu.pipeline_mode<synchronous>, transform_indices = @transform_2, window_bounds = array<i64: 1, 128>}, {transform_indices = @transform_3, window_bounds = array<i64: 128, 128>}, {transform_indices = @transform_4, window_bounds = array<i64: 1, 128>}, {transform_indices = @transform_5, window_bounds = array<i64: 128, 128>}]} {
    %c0 = arith.constant 0 : index
    %c0_0 = arith.constant 0 : index
    %0 = vector.load %arg2[%c0, %c0_0] : memref<128x128xf32, #tpu.memory_space<vmem>>, vector<128x128xf32>
    %cst = arith.constant dense<0.000000e+00> : vector<128xf32>
    %1 = vector.multi_reduction <add>, %0, %cst [1] : vector<128x128xf32> to vector<128xf32>
    %2 = vector.shape_cast %1 : vector<128xf32> to vector<128x1xf32>
    %3 = arith.mulf %0, %0 : vector<128x128xf32>
    %cst_1 = arith.constant dense<0.000000e+00> : vector<128xf32>
    %4 = vector.multi_reduction <add>, %3, %cst_1 [1] : vector<128x128xf32> to vector<128xf32>
    %5 = vector.shape_cast %4 : vector<128xf32> to vector<128x1xf32>
    %cst_2 = arith.constant 3.125000e-02 : f32
    %6 = vector.broadcast %cst_2 : f32 to vector<128x1xf32>
    %7 = arith.mulf %2, %6 : vector<128x1xf32>
    %cst_3 = arith.constant 3.125000e-02 : f32
    %8 = vector.broadcast %cst_3 : f32 to vector<128x1xf32>
    %9 = arith.mulf %5, %8 : vector<128x1xf32>
    %10 = arith.mulf %7, %7 : vector<128x1xf32>
    %11 = arith.subf %9, %10 : vector<128x1xf32>
    %cst_4 = arith.constant 0.000000e+00 : f32
    %12 = vector.broadcast %cst_4 : f32 to vector<128x1xf32>
    %13 = arith.maximumf %11, %12 : vector<128x1xf32>
    %cst_5 = arith.constant 9.99999974E-6 : f32
    %14 = vector.broadcast %cst_5 : f32 to vector<128x1xf32>
    %15 = arith.addf %13, %14 : vector<128x1xf32>
    %16 = math.rsqrt %15 : vector<128x1xf32>
    %17 = vector.broadcast %7 : vector<128x1xf32> to vector<128x128xf32>
    %18 = arith.subf %0, %17 : vector<128x128xf32>
    %19 = vector.broadcast %16 : vector<128x1xf32> to vector<128x128xf32>
    %20 = arith.mulf %18, %19 : vector<128x128xf32>
    %c0_6 = arith.constant 0 : index
    %c0_7 = arith.constant 0 : index
    %21 = vector.load %arg3[%c0_6, %c0_7] : memref<1x128xf32, #tpu.memory_space<vmem>>, vector<1x128xf32>
    %22 = vector.broadcast %21 : vector<1x128xf32> to vector<128x128xf32>
    %23 = arith.mulf %20, %22 : vector<128x128xf32>
    %c0_8 = arith.constant 0 : index
    %c0_9 = arith.constant 0 : index
    %24 = vector.load %arg4[%c0_8, %c0_9] : memref<1x128xf32, #tpu.memory_space<vmem>>, vector<1x128xf32>
    %25 = vector.broadcast %24 : vector<1x128xf32> to vector<128x128xf32>
    %26 = arith.addf %23, %25 : vector<128x128xf32>
    %c0_10 = arith.constant 0 : index
    %c0_11 = arith.constant 0 : index
    %27 = vector.load %arg5[%c0_10, %c0_11] : memref<128x128xf32, #tpu.memory_space<vmem>>, vector<128x128xf32>
    %cst_12 = arith.constant dense<0.000000e+00> : vector<128x128xf32>
    %28 = tpu.matmul %26, %27, %cst_12 {dimension_numbers = #tpu.dot_dimension_numbers<[1], [0], [0], [1], [0, 0, 1, 1], [], []>} : vector<128x128xf32>, vector<128x128xf32>, vector<128x128xf32> -> vector<128x128xf32>
    %c0_13 = arith.constant 0 : index
    %c0_14 = arith.constant 0 : index
    %29 = vector.load %arg6[%c0_13, %c0_14] : memref<1x128xf32, #tpu.memory_space<vmem>>, vector<1x128xf32>
    %30 = vector.broadcast %29 : vector<1x128xf32> to vector<128x128xf32>
    %31 = arith.addf %28, %30 : vector<128x128xf32>
    %c0_15 = arith.constant 0 : index
    %c0_16 = arith.constant 0 : index
    %32 = vector.load %arg7[%c0_15, %c0_16] : memref<128x128xf32, #tpu.memory_space<vmem>>, vector<128x128xf32>
    tpu.vector_store %arg7[%c0_15, %c0_16], %31 {strides = array<i32>} : memref<128x128xf32, #tpu.memory_space<vmem>>, vector<128x128xf32>,
    return
  }
  func.func @transform_0(%arg0: i32, %arg1: i32) -> (i32, i32) {
    %c0_i32 = arith.constant 0 : i32
    %c0_i32_0 = arith.constant 0 : i32
    return %arg0, %c0_i32 : i32, i32
  }
  func.func @transform_1(%arg0: i32, %arg1: i32) -> (i32, i32) {
    %c0_i32 = arith.constant 0 : i32
    %c0_i32_0 = arith.constant 0 : i32
    %c0_i32_1 = arith.constant 0 : i32
    return %c0_i32, %c0_i32_0 : i32, i32
  }
  func.func @transform_2(%arg0: i32, %arg1: i32) -> (i32, i32) {
    %c0_i32 = arith.constant 0 : i32
    %c0_i32_0 = arith.constant 0 : i32
    %c0_i32_1 = arith.constant 0 : i32
    return %c0_i32, %c0_i32_0 : i32, i32
  }
  func.func @transform_3(%arg0: i32, %arg1: i32) -> (i32, i32) {
    %c0_i32 = arith.constant 0 : i32
    %c0_i32_0 = arith.constant 0 : i32
    return %c0_i32, %arg1 : i32, i32
  }
  func.func @transform_4(%arg0: i32, %arg1: i32) -> (i32, i32) {
    %c0_i32 = arith.constant 0 : i32
    %c0_i32_0 = arith.constant 0 : i32
    return %c0_i32, %arg1 : i32, i32
  }
  func.func @transform_5(%arg0: i32, %arg1: i32) -> (i32, i32) {
    %c0_i32 = arith.constant 0 : i32
    return %arg0, %arg1 : i32, i32
  }
}

</mosaic_0001>

<bundles_post_ra>
// kernel: tpu_custom_call.1
= control target key start
LH: loop header
LB: loop body
LE: loop exit
PB: predicated region body
PF: predicated region fallthrough
CT: control target
= control target key end

     0   :  { %10 = vsyncpa [#allocation3], 0  ;;  %s1820_s0 = inlined_call_operand.hbm [shape: f32[256,128], index: 0, kind: input, shape index: {}]   ;;  %s1821_s1 = inlined_call_operand.vmem [shape: f32[1,128], index: 1, kind: input, shape index: {}]   ;;  %s1822_s2 = inlined_call_operand.vmem [shape: f32[1,128], index: 2, kind: input, shape index: {}]   ;;  %s1823_s3 = inlined_call_operand.hbm [shape: f32[128,128], index: 3, kind: input, shape index: {}]   ;;  %s1824_s4 = inlined_call_operand.vmem [shape: f32[1,128], index: 4, kind: input, shape index: {}]   ;;  %s1825_s5 = inlined_call_operand.hbm [shape: f32[256,128], index: 5, kind: output, shape index: {}]  }
   0x1   :  { %12 = vsyncpa [#allocation3 + $0x1], 0 }
   0x2   :  { %13 = vsyncpa [#allocation6], 0 }
   0x3   :  { %14 = vsyncpa [#allocation4], 0 }
   0x4   :  { %16 = vsyncpa [#allocation4 + $0x1], 0  ;;  %s1338_s18 = smov 0   ;;  %s1340_s19 = smov 0  }
   0x5   :  { %s1342_s20 = smov 0   ;;  %s1344_s21 = smov 0  }
   0x6   :  { %s1346_s22 = smov 0   ;;  %s1348_s23 = smov 0  }
   0x7 LB: > { %s887_s24 = sadd.s32 4294967295, %s1299_s23   ;;  %s888_s25 = sadd.s32 4294967294, %s1299_s23   ;;  %s1299_s23 = sphi %s1348_s23, %s22_s23   ;;  %s1295_s22 = sphi %s1346_s22, %s1851_s22   ;;  %s1291_s21 = sphi %s1344_s21, %s1850_s21   ;;  %s1287_s20 = sphi %s1342_s20, %s1849_s20   ;;  %s1283_s19 = sphi %s1340_s19, %s1848_s19   ;;  %s1279_s18 = sphi %s1338_s18, %s1847_s18  }
   0x8   : > { %p54_p0 = scmp.ne.s32.totalorder %s1283_s19, %s1279_s18  ;;  %p1372_p1 = scmp.eq.s32.totalorder %s887_s24, 0 }
   0x9   : > { %p1376_p2 = scmp.eq.s32.totalorder %s887_s24, 1  ;;  %p180_p3 = scmp.eq.s32.totalorder %s888_s25, 1 }
   0xa   : > { %s1831_s26 = scalar_select %p1372_p1, 1, 0 }
   0xb   : > { %s1832_s27 = scalar_select %p1376_p2, 1, 0 }
   0xc   : > { %p1382_p4 = por %p1372_p1, %p54_p0  ;;  %p889_p5 = scmp.ge.s32.totalorder %s1299_s23, 1 }
   0xd   : > { %p1387_p6 = por %p180_p3, %p54_p0  ;;  %p187_p7 = scmp.lt.s32.totalorder %s1299_s23, 3 }
   0xe   : > { %s1833_s28 = scalar_select %p1382_p4, 1, 0 }
   0xf   : > { %s1834_s29 = scalar_select %p1387_p6, 1, 0 }
  0x10   : > { %p1392_p8 = pnand %p889_p5, %p187_p7  ;;  %s1301_s6 = smov [#allocation5]  }
  0x11   : > { %s207_s7 = sshll.u32 %s1301_s6, 4  ;;  %s34_s9 = sadd.s32 1, %s1295_s22  ;;  %s208_s7 = int_to_ptr.vmem [resolvable:$true] %s207_s7 }
  0x12   : > { %s1835_s30 = scalar_select %p1392_p8, 1, 0 }
  0x13   : > { %p1054_p9 = pneg %p1392_p8  ;;  %s1155_s12 = scalar_lea.hbm %s1823_s3, 2048 }
  0x14   : > { %p1156_p12 = scmp.ne.s32.totalorder %s1823_s3, %s1155_s12  ;;  %p1162_p5 = scmp.lt.u32.totalorder %s1155_s12, %s1823_s3 }
  0x15   : > { %p1401_p11 = pnand %p1054_p9, %p1372_p1 }
  0x17   : > { %p1157_p13 = pneg %p1401_p11 }
  0x19   : > { %p1158_p0 = pnand %p1157_p13, %p1156_p12 }
  0x1b   : > { %p1159_p3 = pneg %p1158_p0 }
  0x1d   : > { %p1164_p7 = pnand %p1162_p5, %p1159_p3 }
  0x1f   : > { %1167 = shalt.err (!%p1164_p7)
}
  0x20   : > { %s1168_s17 = scalar_lea.vmem %s208_s7, 2048  ;;  %p1176_p1 = scmp.lt.s32.totalorder %s208_s7, %s208_s7 }
  0x21   : > { %p1169_p9 = scmp.ne.s32.totalorder %s208_s7, %s1168_s17  ;;  %p1177_p4 = scmp.lt.s32.totalorder %s1168_s17, %s1168_s17 }
  0x23   : > { %p1171_p10 = pnand %p1169_p9, %p1157_p13  ;;  %p1178_p8 = por %p1177_p4, %p1176_p1 }
  0x25   : > { %p1172_p6 = pneg %p1171_p10 }
  0x27   : > { %p1179_p2 = pnand %p1178_p8, %p1172_p6 }
  0x29   : > { %1182 = shalt.err (!%p1179_p2)
}
  0x2a   : > { %s1830_s24 = smov 128   ;;  %s1303_s25 = smov 8  }
  0x2b   : > { %1057 = dma.hbm_to_vmem [thread:$0]  (!%p1401_p11), %s1823_s3, 2048, %s208_s7, [#allocation6], %s1830_s24, %s1830_s24, %s1303_s25  }
  0x2c   : > { %p36_p1 = scmp.ge.s32.totalorder %s34_s9, 2  ;;  %s41_s11 = sadd.s32 1, %s1287_s20 }
  0x2d   : > { %p48_p2 = scmp.ne.s32.totalorder %s1287_s20, %s1283_s19  ;;  %p49_p4 = scmp.eq.s32.totalorder %s1299_s23, 0 }
  0x2e   : > { %s1853_s9 = smov (%p36_p1, %s34_s9), 0  ;;  %p1838_p8 = scmp.ne.s32.totalorder %s1832_s27, 0 }
  0x2f   : > { %p1431_p6 = por %p49_p4, %p48_p2  ;;  %s38_s13 = ssub.s32 %s1295_s22, %s1853_s9 }
  0x30   : > { %p1437_p10 = por %p1838_p8, %p48_p2  ;;  %p1067_p12 = scmp.lt.s32.totalorder %s1299_s23, 2 }
  0x31   : > { %p39_p11 = scmp.eq.s32.totalorder %s38_s13, 0  ;;  %s227_s7 = sand.u32 1, %s1287_s20  }
  0x32   : > { %s893_s14 = sshll.u32 %s227_s7, 7  ;;  %s908_s16 = sshll.u32 %s1295_s22, 11 }
  0x33   : > { %s1446_s15 = scalar_select %p39_p11, %s1287_s20, %s41_s11  }
  0x34   : > { %s1452_s10 = scalar_lea.hbm %s1820_s0, %s908_s16  ;;  %s231_s27 = scalar_lea.vmem [#allocation2], %s893_s14 }
  0x35   : > { %s238_s24 = sshll.u32 %s231_s27, 4  ;;  %p1458_p13 = pnand %p1067_p12, %p1431_p6  ;;  %s1454_s24 = int_to_ptr.vmem [resolvable:$true] %s238_s24 }
  0x36   : > { %s1462_s11 = scalar_lea.sflag [#allocation3], %s227_s7  ;;  %s1183_s17 = scalar_lea.hbm %s1452_s10, 2048 }
  0x37   : > { %p1184_p0 = scmp.ne.s32.totalorder %s1452_s10, %s1183_s17  ;;  %p1185_p3 = pneg %p1458_p13 }
  0x38   : > { %s1188_s12 = scalar_lea.hbm %s1820_s0, 4096  ;;  %p1189_p9 = scmp.lt.u32.totalorder %s1452_s10, %s1820_s0 }
  0x39   : > { %p1186_p5 = pnand %p1185_p3, %p1184_p0  ;;  %p1190_p1 = scmp.lt.u32.totalorder %s1188_s12, %s1183_s17 }
  0x3a   : > { %p1192_p4 = scmp.lt.u32.totalorder %s1183_s17, %s1452_s10 }
  0x3b   : > { %p1187_p7 = pneg %p1186_p5  ;;  %p1191_p2 = por %p1190_p1, %p1189_p9 }
  0x3d   : > { %p1193_p6 = por %p1192_p4, %p1191_p2 }
  0x3f   : > { %p1194_p8 = pnand %p1193_p6, %p1187_p7 }
  0x41   : > { %1197 = shalt.err (!%p1194_p8)
}
  0x42   : > { %s1198_s7 = scalar_lea.vmem %s1454_s24, 2048  ;;  %s1304_s14 = smov [#allocation2]  }
  0x43   : > { %p1199_p12 = scmp.ne.s32.totalorder %s1454_s24, %s1198_s7  ;;  %s1203_s16 = sshll.u32 %s1304_s14, 4  ;;  %s1204_s16 = int_to_ptr.vmem [resolvable:$false] %s1203_s16 }
  0x44   : > { %s1205_s6 = scalar_lea.vmem %s1204_s16, 4096  ;;  %p1206_p5 = scmp.lt.s32.totalorder %s1454_s24, %s1204_s16 }
  0x45   : > { %p1201_p11 = pnand %p1199_p12, %p1185_p3  ;;  %p1207_p9 = scmp.lt.s32.totalorder %s1205_s6, %s1198_s7 }
  0x47   : > { %p1202_p0 = pneg %p1201_p11  ;;  %p1208_p1 = por %p1207_p9, %p1206_p5 }
  0x49   : > { %p1209_p2 = pnand %p1208_p1, %p1202_p0 }
  0x4b   : > { %1212 = shalt.err (!%p1209_p2)
}
  0x4c   : > { %s1841_s17 = smov 128   ;;  %p1842_p3 = scmp.ne.s32.totalorder %s1835_s30, 0 }
  0x4d   : > { %1061 = dma.hbm_to_vmem [thread:$0]  (!%p1458_p13), %s1452_s10, 2048, %s1454_s24, %s1462_s11, %s1841_s17, %s1841_s17, %s1303_s25  }
  0x4e   : > { %250 = sbr.rel (%p1842_p3) target bundleno = 548 (0x224), region = 40  ;;  %s1496_s12 = sand.u32 (!%p1842_p3), 1, %s1283_s19  }
  0x4f   : > { %s897_s27 = sshll.u32 (!%p1842_p3), %s1496_s12, 7  ;;  %s253_s7 = scalar_lea.sflag (!%p1842_p3), [#allocation3], %s1496_s12 }
  0x50   : > { %s1502_s13 = scalar_lea.vmem (!%p1842_p3), [#allocation2], %s897_s27  ;;  %p1843_p7 = scmp.ne.s32.totalorder (!%p1842_p3), %s1833_s28, 0 }
  0x55   : > { %1266 = dma.done.wait (%p1843_p7), %s253_s7, 2048  }
  0x56   : > { %1268 = vsyncadd (%p1843_p7), %s253_s7, 4294965248  ;;  %p1844_p13 = scmp.ne.s32.totalorder %s1831_s26, 0 }
  0x58   : > { %1270 = dma.done.wait (%p1844_p13), [#allocation6], 2048  }
  0x59   : > { %1272 = vsyncadd (%p1844_p13), [#allocation6], 4294965248  ;;  %v1513_v0 = vld [vmem:[%s1502_s13 + $0x8] sm:$0xff]  ;;  %v1516_v1 = vld [vmem:[%s1502_s13] sm:$0xff]  ;;  %s1746_s11 = scalar_lea.vmem [#allocation7], %s897_s27  ;;  %s909_s14 = sshll.u32 %s1291_s21, 11 }
  0x5a   : > { %313 = vadd.xlane.f32.xlu1 %v1513_v0  ;;  %311 = vadd.xlane.f32.xlu0 %v1516_v1  ;;  %v1521_v2 = vld [vmem:[%s1502_s13 + $0x48] sm:$0xff]  ;;  %v1524_v3 = vld [vmem:[%s1502_s13 + $0x40] sm:$0xff]  ;;  %v343_v5 = vmul.f32 %v1516_v1, %v1516_v1  ;;  %v344_v7 = vmul.f32 %v1513_v0, %v1513_v0  ;;  %v1537_v8 = vld [vmem:[%s1502_s13 + $0x50] sm:$0xff]  ;;  %s780_s16 = sshll.u32 %s1746_s11, 4  ;;  %s1765_s27 = scalar_lea.hbm %s1825_s5, %s909_s14  ;;  %s1767_s16 = int_to_ptr.vmem [resolvable:$true] %s780_s16 }
  0x5b   : > { %v351_v4 = vmul.f32 %v1524_v3, %v1524_v3  ;;  %v352_v6 = vmul.f32 %v1521_v2, %v1521_v2  ;;  %v1540_v9 = vld [vmem:[%s1502_s13 + $0x10] sm:$0xff]  ;;  %v581_v10 = vld [vmem:[#allocation5] sm:$0xff]  ;;  %v582_v11 = vld [vmem:[#allocation5 + $0x8] sm:$0xff]  ;;  %v353_v15 = vmul.f32 %v1537_v8, %v1537_v8  ;;  %s766_s21 = scalar_lea.sflag [#allocation4], %s1496_s12  ;;  %s1213_s7 = scalar_lea.vmem %s1767_s16, 2048 }
  0x5c   : > { %v1545_v12 = vld [vmem:[%s1502_s13 + $0x58] sm:$0xff]  ;;  %v998_v14 = vpack.c.bf16 %v582_v11, %v581_v10  ;;  %v345_v16 = vmul.f32 %v1540_v9, %v1540_v9  ;;  %v583_v17 = vld [vmem:[#allocation5 + $0x10] sm:$0xff]  ;;  %v585_v22 = vld [vmem:[#allocation5 + $0x20] sm:$0xff]  ;;  %p1214_p4 = scmp.ne.s32.totalorder %s1767_s16, %s1213_s7 }
  0x5d   : > { %v1548_v13 = vld [vmem:[%s1502_s13 + $0x18] sm:$0xff]  ;;  %v354_v20 = vmul.f32 %v1545_v12, %v1545_v12  ;;  %v586_v23 = vld [vmem:[#allocation5 + $0x28] sm:$0xff]  ;;  %v1561_v25 = vld [vmem:[%s1502_s13 + $0x60] sm:$0xff] }
  0x5e   : > { %329 = vadd.xlane.f32.xlu1 %v1521_v2  ;;  %327 = vadd.xlane.f32.xlu0 %v1524_v3  ;;  %v584_v18 = vld [vmem:[#allocation5 + $0x18] sm:$0xff]  ;;  %v346_v21 = vmul.f32 %v1548_v13, %v1548_v13  ;;  %v1006_v24 = vpack.c.bf16 %v586_v23, %v585_v22  ;;  %v1564_v26 = vld [vmem:[%s1502_s13 + $0x20] sm:$0xff]  ;;  %v587_v27 = vld [vmem:[#allocation5 + $0x30] sm:$0xff]  ;;  %v355_v35 = vmul.f32 %v1561_v25, %v1561_v25  ;;  %p1215_p6 = pnand %p1214_p4, %p1437_p10 }
  0x5f   : > { %999 = vmatprep.subr.bf16.mxu0 %v998_v14  ;;  %1030 = vmatprep.subr.bf16.mxu1 %v998_v14  ;;  %v1002_v19 = vpack.c.bf16 %v584_v18, %v583_v17  ;;  %v588_v28 = vld [vmem:[#allocation5 + $0x38] sm:$0xff]  ;;  %v1569_v30 = vld [vmem:[%s1502_s13 + $0x68] sm:$0xff]  ;;  %v589_v32 = vld [vmem:[#allocation5 + $0x40] sm:$0xff]  ;;  %v347_v36 = vmul.f32 %v1564_v26, %v1564_v26 }
  0x60   : > { %1001 = vmatpush3.bf16.msra.mxu0 %v998_v14  ;;  %1038 = vmatpush3.bf16.msra.mxu1 %v998_v14  ;;  %v1010_v29 = vpack.c.bf16 %v588_v28, %v587_v27  ;;  %v1572_v31 = vld [vmem:[%s1502_s13 + $0x28] sm:$0xff]  ;;  %v591_v37 = vld [vmem:[#allocation5 + $0x50] sm:$0xff]  ;;  %v592_v38 = vld [vmem:[#allocation5 + $0x58] sm:$0xff]  ;;  %v356_v40 = vmul.f32 %v1569_v30, %v1569_v30  ;;  %p1216_p8 = pneg %p1215_p6 }
  0x61   : > { %1003 = vmatprep.subr.bf16.mxu0 %v1002_v19  ;;  %1031 = vmatprep.subr.bf16.mxu1 %v1002_v19  ;;  %v590_v33 = vld [vmem:[#allocation5 + $0x48] sm:$0xff]  ;;  %v1018_v39 = vpack.c.bf16 %v592_v38, %v591_v37  ;;  %v348_v41 = vmul.f32 %v1572_v31, %v1572_v31  ;;  %v593_v42 = vld [vmem:[#allocation5 + $0x60] sm:$0xff]  ;;  %v1585_v45 = vld [vmem:[%s1502_s13 + $0x70] sm:$0xff] }
  0x62   : > { %375 = vadd.xlane.f32.xlu1 %v351_v4  ;;  %359 = vadd.xlane.f32.xlu0 %v343_v5  ;;  %v1014_v34 = vpack.c.bf16 %v590_v33, %v589_v32  ;;  %v594_v43 = vld [vmem:[#allocation5 + $0x68] sm:$0xff]  ;;  %v1588_v46 = vld [vmem:[%s1502_s13 + $0x30] sm:$0xff]  ;;  %v596_v48 = vld [vmem:[#allocation5 + $0x78] sm:$0xff]  ;;  %v357_v52 = vmul.f32 %v1585_v45, %v1585_v45 }
  0x63   : > { %v1022_v44 = vpack.c.bf16 %v594_v43, %v593_v42  ;;  %v595_v47 = vld [vmem:[#allocation5 + $0x70] sm:$0xff]  ;;  %v1593_v50 = vld [vmem:[%s1502_s13 + $0x78] sm:$0xff]  ;;  %v349_v53 = vmul.f32 %v1588_v46, %v1588_v46 }
  0x64   : > { %1005 = vmatpush3.bf16.msra.mxu0 %v1002_v19  ;;  %1039 = vmatpush3.bf16.msra.mxu1 %v1002_v19  ;;  %v1026_v49 = vpack.c.bf16 %v596_v48, %v595_v47  ;;  %v1596_v51 = vld [vmem:[%s1502_s13 + $0x38] sm:$0xff]  ;;  %v358_v54 = vmul.f32 %v1593_v50, %v1593_v50  ;;  %s1305_s13 = smov [#allocation7]  }
  0x65   : > { %1007 = vmatprep.subr.bf16.mxu0 %v1006_v24  ;;  %1032 = vmatprep.subr.bf16.mxu1 %v1006_v24  ;;  %v350_v55 = vmul.f32 %v1596_v51, %v1596_v51  ;;  %s1217_s26 = sshll.u32 %s1305_s13, 4  ;;  %s1218_s26 = int_to_ptr.vmem [resolvable:$false] %s1217_s26 }
  0x66   : > { %377 = vadd.xlane.f32.xlu1 %v352_v6  ;;  %361 = vadd.xlane.f32.xlu0 %v344_v7  ;;  %s1219_s28 = scalar_lea.vmem %s1218_s26, 4096  ;;  %p1220_p12 = scmp.lt.s32.totalorder %s1767_s16, %s1218_s26 }
  0x67   : > { %p1221_p11 = scmp.lt.s32.totalorder %s1219_s28, %s1213_s7 }
  0x68   : > { %1009 = vmatpush3.bf16.msra.mxu0 %v1006_v24  ;;  %1040 = vmatpush3.bf16.msra.mxu1 %v1006_v24 }
  0x69   : > { %1011 = vmatprep.subr.bf16.mxu0 %v1010_v29  ;;  %1033 = vmatprep.subr.bf16.mxu1 %v1010_v29  ;;  %p1222_p0 = por %p1221_p11, %p1220_p12 }
  0x6a   : > { %331 = vadd.xlane.f32.xlu1 %v1537_v8  ;;  %315 = vadd.xlane.f32.xlu0 %v1540_v9 }
  0x6b   : > { %p1223_p5 = pnand %p1222_p0, %p1216_p8 }
  0x6c   : > { %1013 = vmatpush3.bf16.msra.mxu0 %v1010_v29  ;;  %1041 = vmatpush3.bf16.msra.mxu1 %v1010_v29 }
  0x6d   : > { %1015 = vmatprep.subr.bf16.mxu0 %v1014_v34  ;;  %1034 = vmatprep.subr.bf16.mxu1 %v1014_v34 }
  0x6e   : > { %333 = vadd.xlane.f32.xlu1 %v1545_v12  ;;  %317 = vadd.xlane.f32.xlu0 %v1548_v13 }
  0x70   : > { %1017 = vmatpush3.bf16.msra.mxu0 %v1014_v34  ;;  %1042 = vmatpush3.bf16.msra.mxu1 %v1014_v34 }
  0x71   : > { %1019 = vmatprep.subr.bf16.mxu0 %v1018_v39  ;;  %1035 = vmatprep.subr.bf16.mxu1 %v1018_v39 }
  0x72   : > { %379 = vadd.xlane.f32.xlu1 %v353_v15  ;;  %363 = vadd.xlane.f32.xlu0 %v345_v16 }
  0x74   : > { %1021 = vmatpush3.bf16.msra.mxu0 %v1018_v39  ;;  %1043 = vmatpush3.bf16.msra.mxu1 %v1018_v39 }
  0x75   : > { %1023 = vmatprep.subr.bf16.mxu0 %v1022_v44  ;;  %1036 = vmatprep.subr.bf16.mxu1 %v1022_v44 }
  0x76   : > { %381 = vadd.xlane.f32.xlu1 %v354_v20  ;;  %365 = vadd.xlane.f32.xlu0 %v346_v21 }
  0x78   : > { %1025 = vmatpush3.bf16.msra.mxu0 %v1022_v44  ;;  %1044 = vmatpush3.bf16.msra.mxu1 %v1022_v44 }
  0x79   : > { %1027 = vmatprep.subr.bf16.mxu0 %v1026_v49  ;;  %1037 = vmatprep.subr.bf16.mxu1 %v1026_v49 }
  0x7a   : > { %335 = vadd.xlane.f32.xlu1 %v1561_v25  ;;  %319 = vadd.xlane.f32.xlu0 %v1564_v26 }
  0x7c   : > { %1029 = vmatpush3.bf16.msra.mxu0 %v1026_v49  ;;  %1045 = vmatpush3.bf16.msra.mxu1 %v1026_v49 }
  0x7e   : > { %337 = vadd.xlane.f32.xlu1 %v1569_v30  ;;  %321 = vadd.xlane.f32.xlu0 %v1572_v31 }
  0x82   : > { %383 = vadd.xlane.f32.xlu1 %v355_v35  ;;  %367 = vadd.xlane.f32.xlu0 %v347_v36 }
  0x86   : > { %385 = vadd.xlane.f32.xlu1 %v356_v40  ;;  %369 = vadd.xlane.f32.xlu0 %v348_v41 }
  0x8a   : > { %339 = vadd.xlane.f32.xlu1 %v1585_v45  ;;  %323 = vadd.xlane.f32.xlu0 %v1588_v46 }
  0x8e   : > { %341 = vadd.xlane.f32.xlu1 %v1593_v50  ;;  %325 = vadd.xlane.f32.xlu0 %v1596_v51 }
  0x92   : > { %387 = vadd.xlane.f32.xlu1 %v357_v52  ;;  %371 = vadd.xlane.f32.xlu0 %v349_v53 }
  0x96   : > { %389 = vadd.xlane.f32.xlu1 %v358_v54  ;;  %373 = vadd.xlane.f32.xlu0 %v350_v55 }
  0xe7   : > { %v314_v56 = vpop.xlane.xlu1 %313  ;;  %v312_v57 = vpop.xlane.xlu0 %311 }
  0xe8   : > { %v1608_v60 = vmul.f32 0.03125, %v312_v57  ;;  %v1610_v62 = vmul.f32 0.03125, %v314_v56 }
  0xea   : > { %v423_v6 = vmul.f32 %v1608_v60, %v1608_v60  ;;  %v424_v16 = vmul.f32 %v1610_v62, %v1610_v62 }
  0xeb   : > { %v330_v58 = vpop.xlane.xlu1 %329  ;;  %v328_v59 = vpop.xlane.xlu0 %327 }
  0xec   : > { %v399_v61 = vmul.f32 0.03125, %v328_v59  ;;  %v1612_v63 = vmul.f32 0.03125, %v330_v58  ;;  %v1636_v58 = vld [vmem:[%s1821_s1] ss:$0 sm:$0xff] }
  0xee   : > { %v431_v7 = vmul.f32 %v399_v61, %v399_v61  ;;  %v432_v17 = vmul.f32 %v1612_v63, %v1612_v63  ;;  %v511_v54 = vsub.f32 %v1524_v3, %v399_v61 }
  0xef   : > { %v376_v4 = vpop.xlane.xlu1 %375  ;;  %v360_v5 = vpop.xlane.xlu0 %359 }
  0xf0   : > { %v415_v10 = vmul.f32 0.03125, %v376_v4  ;;  %v407_v11 = vmul.f32 0.03125, %v360_v5  ;;  %v503_v4 = vsub.f32 %v1516_v1, %v1608_v60  ;;  %v512_v1 = vsub.f32 %v1521_v2, %v1612_v63 }
  0xf2   : > { %v447_v14 = vsub.f32 %v415_v10, %v431_v7  ;;  %v439_v15 = vsub.f32 %v407_v11, %v423_v6 }
  0xf3   : > { %v378_v18 = vpop.xlane.xlu1 %377  ;;  %v362_v19 = vpop.xlane.xlu0 %361 }
  0xf4   : > { %v463_v20 = vmax.f32 %v447_v14, 0.0  ;;  %v455_v21 = vmax.f32 %v439_v15, 0.0  ;;  %v416_v22 = vmul.f32 0.03125, %v378_v18  ;;  %v408_v23 = vmul.f32 0.03125, %v362_v19 }
  0xf6   : > { %v479_v24 = vadd.f32 1e-05, %v463_v20  ;;  %v471_v27 = vadd.f32 1e-05, %v455_v21  ;;  %v448_v28 = vsub.f32 %v416_v22, %v432_v17  ;;  %v440_v29 = vsub.f32 %v408_v23, %v424_v16  ;;  %v1647_v16 = vld [vmem:[%s1822_s2] ss:$0 sm:$0xff] }
  0xf7   : > { %v332_v32 = vpop.xlane.xlu1 %331  ;;  %v316_v33 = vpop.xlane.xlu0 %315 }
  0xf8   : > { %1123 = vrsqrt.f32 %v479_v24  ;;  %v464_v34 = vmax.f32 %v448_v28, 0.0  ;;  %v456_v35 = vmax.f32 %v440_v29, 0.0  ;;  %v1620_v40 = vmul.f32 0.03125, %v332_v32 }
  0xf9   : > { %1125 = vrsqrt.f32 %v471_v27  ;;  %v1622_v41 = vmul.f32 0.03125, %v316_v33  ;;  %v504_v24 = vsub.f32 %v1513_v0, %v1610_v62 }
  0xfa   : > { %v480_v36 = vadd.f32 1e-05, %v464_v34  ;;  %v472_v37 = vadd.f32 1e-05, %v456_v35  ;;  %v433_v48 = vmul.f32 %v1620_v40, %v1620_v40 }
  0xfb   : > { %v334_v38 = vpop.xlane.xlu1 %333  ;;  %v318_v39 = vpop.xlane.xlu0 %317  ;;  %v425_v49 = vmul.f32 %v1622_v41, %v1622_v41 }
  0xfc   : > { %1127 = vrsqrt.f32 %v480_v36  ;;  %v1624_v42 = vmul.f32 0.03125, %v334_v38  ;;  %v1626_v43 = vmul.f32 0.03125, %v318_v39 }
  0xfd   : > { %1129 = vrsqrt.f32 %v472_v37 }
  0xfe   : > { %v434_v5 = vmul.f32 %v1624_v42, %v1624_v42  ;;  %v426_v6 = vmul.f32 %v1626_v43, %v1626_v43 }
  0xff   : > { %v380_v44 = vpop.xlane.xlu1 %379  ;;  %v364_v47 = vpop.xlane.xlu0 %363 }
 0x100   : > { %v417_v52 = vmul.f32 0.03125, %v380_v44  ;;  %v409_v53 = vmul.f32 0.03125, %v364_v47 }
 0x102   : > { %v1124_v55 = vpop.eup %1123  ;;  %v449_v56 = vsub.f32 %v417_v52, %v433_v48  ;;  %v441_v57 = vsub.f32 %v409_v53, %v425_v49 }
 0x103   : > { %v1126_v59 = vpop.eup %1125  ;;  %v382_v7 = vpop.xlane.xlu1 %381  ;;  %v527_v61 = vmul.f32 %v1124_v55, %v511_v54 }
 0x104   : > { %v366_v3 = vpop.xlane.xlu0 %365  ;;  %v465_v10 = vmax.f32 %v449_v56, 0.0  ;;  %v457_v11 = vmax.f32 %v441_v57, 0.0  ;;  %v418_v14 = vmul.f32 0.03125, %v382_v7  ;;  %v519_v60 = vmul.f32 %v1126_v59, %v503_v4 }
 0x105   : > { %v410_v15 = vmul.f32 0.03125, %v366_v3  ;;  %v550_v17 = vmul.f32 %v1636_v58, %v527_v61 }
 0x106   : > { %v1128_v18 = vpop.eup %1127  ;;  %v481_v19 = vadd.f32 1e-05, %v465_v10  ;;  %v473_v20 = vadd.f32 1e-05, %v457_v11  ;;  %v450_v21 = vsub.f32 %v418_v14, %v434_v5  ;;  %v542_v29 = vmul.f32 %v1636_v58, %v519_v60 }
 0x107   : > { %v442_v22 = vsub.f32 %v410_v15, %v426_v6  ;;  %v1130_v23 = vpop.eup %1129  ;;  %v336_v27 = vpop.xlane.xlu1 %335  ;;  %v573_v32 = vadd.f32 %v1647_v16, %v550_v17  ;;  %v528_v33 = vmul.f32 %v1128_v18, %v512_v1  ;;  %v513_v5 = vsub.f32 %v1537_v8, %v1620_v40 }
 0x108   : > { %v320_v28 = vpop.xlane.xlu0 %319  ;;  %1131 = vrsqrt.f32 %v481_v19  ;;  %v466_v2 = vmax.f32 %v450_v21, 0.0  ;;  %v565_v34 = vadd.f32 %v1647_v16, %v542_v29  ;;  %v520_v35 = vmul.f32 %v1130_v23, %v504_v24 }
 0x109   : > { %v458_v63 = vmax.f32 %v442_v22, 0.0  ;;  %1133 = vrsqrt.f32 %v473_v20  ;;  %986 = vmatprep.mubr.f32.mxu1 %v573_v32  ;;  %v551_v39 = vmul.f32 %v1636_v58, %v528_v33  ;;  %v1659_v44 = vmul.f32 0.03125, %v336_v27 }
 0x10a   : > { %v482_v36 = vadd.f32 1e-05, %v466_v2  ;;  %974 = vmatprep.mubr.f32.mxu0 %v565_v34  ;;  %v543_v62 = vmul.f32 %v1636_v58, %v520_v35  ;;  %v1661_v47 = vmul.f32 0.03125, %v320_v28  ;;  %v505_v10 = vsub.f32 %v1540_v9, %v1622_v41 }
 0x10b   : > { %v474_v37 = vadd.f32 1e-05, %v458_v63  ;;  %v338_v38 = vpop.xlane.xlu1 %337  ;;  %v574_v49 = vadd.f32 %v1647_v16, %v551_v39  ;;  %v435_v56 = vmul.f32 %v1659_v44, %v1659_v44  ;;  %v514_v40 = vsub.f32 %v1545_v12, %v1624_v42 }
 0x10c   : > { %v322_v0 = vpop.xlane.xlu0 %321  ;;  %1135 = vrsqrt.f32 %v482_v36  ;;  %v566_v48 = vadd.f32 %v1647_v16, %v543_v62  ;;  %v1665_v52 = vmul.f32 0.03125, %v338_v38  ;;  %v427_v57 = vmul.f32 %v1661_v47, %v1661_v47 }
 0x10d   : > { %1137 = vrsqrt.f32 %v474_v37  ;;  %v1667_v53 = vmul.f32 0.03125, %v322_v0  ;;  %987 = vmatmul.mubr.f32.vlgmr.msra.gmra.mrb[0].mxu1 %v574_v49  ;;  %v506_v28 = vsub.f32 %v1548_v13, %v1626_v43 }
 0x10e   : > { %975 = vmatmul.mubr.f32.vlgmr.msra.gmra.mrb[0].mxu0 %v566_v48  ;;  %v436_v11 = vmul.f32 %v1665_v52, %v1665_v52 }
 0x10f   : > { %v384_v54 = vpop.xlane.xlu1 %383  ;;  %v428_v14 = vmul.f32 %v1667_v53, %v1667_v53 }
 0x110   : > { %v368_v55 = vpop.xlane.xlu0 %367  ;;  %v419_v59 = vmul.f32 0.03125, %v384_v54 }
 0x111   : > { %v411_v4 = vmul.f32 0.03125, %v368_v55 }
 0x112   : > { %v1132_v6 = vpop.eup %1131  ;;  %v451_v7 = vsub.f32 %v419_v59, %v435_v56 }
 0x113   : > { %v443_v3 = vsub.f32 %v411_v4, %v427_v57  ;;  %v1134_v61 = vpop.eup %1133  ;;  %v386_v15 = vpop.xlane.xlu1 %385  ;;  %v529_v60 = vmul.f32 %v1132_v6, %v513_v5 }
 0x114   : > { %v370_v1 = vpop.xlane.xlu0 %369  ;;  %v467_v17 = vmax.f32 %v451_v7, 0.0  ;;  %v420_v19 = vmul.f32 0.03125, %v386_v15  ;;  %v521_v20 = vmul.f32 %v1134_v61, %v505_v10  ;;  %v515_v7 = vsub.f32 %v1561_v25, %v1659_v44 }
 0x115   : > { %v459_v18 = vmax.f32 %v443_v3, 0.0  ;;  %v412_v8 = vmul.f32 0.03125, %v370_v1  ;;  %v552_v21 = vmul.f32 %v1636_v58, %v529_v60  ;;  %v516_v44 = vsub.f32 %v1569_v30, %v1665_v52 }
 0x116   : > { %v1136_v9 = vpop.eup %1135  ;;  %v483_v41 = vadd.f32 1e-05, %v467_v17  ;;  %v452_v23 = vsub.f32 %v420_v19, %v436_v11  ;;  %v544_v33 = vmul.f32 %v1636_v58, %v521_v20  ;;  %v508_v20 = vsub.f32 %v1572_v31, %v1667_v53 }
 0x117   : > { %v475_v22 = vadd.f32 1e-05, %v459_v18  ;;  %v444_v24 = vsub.f32 %v412_v8, %v428_v14  ;;  %v1138_v27 = vpop.eup %1137  ;;  %v340_v29 = vpop.xlane.xlu1 %339  ;;  %v575_v2 = vadd.f32 %v1647_v16, %v552_v21  ;;  %v530_v63 = vmul.f32 %v1136_v9, %v514_v40 }
 0x118   : > { %v324_v32 = vpop.xlane.xlu0 %323  ;;  %1139 = vrsqrt.f32 %v483_v41  ;;  %v468_v12 = vmax.f32 %v452_v23, 0.0  ;;  %v567_v34 = vadd.f32 %v1647_v16, %v544_v33  ;;  %v522_v35 = vmul.f32 %v1138_v27, %v506_v28 }
 0x119   : > { %v460_v42 = vmax.f32 %v444_v24, 0.0  ;;  %1141 = vrsqrt.f32 %v475_v22  ;;  %989 = vmatprep.mubr.f32.mxu1 %v575_v2  ;;  %v553_v0 = vmul.f32 %v1636_v58, %v530_v63  ;;  %v1691_v62 = vmul.f32 0.03125, %v340_v29 }
 0x11a   : > { %v484_v36 = vadd.f32 1e-05, %v468_v12  ;;  %977 = vmatprep.mubr.f32.mxu0 %v567_v34  ;;  %v545_v43 = vmul.f32 %v1636_v58, %v522_v35  ;;  %v1693_v39 = vmul.f32 0.03125, %v324_v32  ;;  %v507_v14 = vsub.f32 %v1564_v26, %v1661_v47 }
 0x11b   : > { %v476_v37 = vadd.f32 1e-05, %v460_v42  ;;  %v342_v38 = vpop.xlane.xlu1 %341  ;;  %v576_v49 = vadd.f32 %v1647_v16, %v553_v0  ;;  %v437_v59 = vmul.f32 %v1691_v62, %v1691_v62  ;;  %v517_v34 = vsub.f32 %v1585_v45, %v1691_v62 }
 0x11c   : > { %v326_v13 = vpop.xlane.xlu0 %325  ;;  %1143 = vrsqrt.f32 %v484_v36  ;;  %v568_v48 = vadd.f32 %v1647_v16, %v545_v43  ;;  %v1697_v54 = vmul.f32 0.03125, %v342_v38  ;;  %v429_v4 = vmul.f32 %v1693_v39, %v1693_v39 }
 0x11d   : > { %1145 = vrsqrt.f32 %v476_v37  ;;  %v1699_v55 = vmul.f32 0.03125, %v326_v13  ;;  %990 = vmatmul.mubr.f32.gmra.mrb[2].mxu1 %v576_v49  ;;  %v509_v36 = vsub.f32 %v1588_v46, %v1693_v39 }
 0x11e   : > { %978 = vmatmul.mubr.f32.gmra.mrb[2].mxu0 %v568_v48  ;;  %v438_v15 = vmul.f32 %v1697_v54, %v1697_v54  ;;  %v518_v43 = vsub.f32 %v1593_v50, %v1697_v54 }
 0x11f   : > { %v388_v56 = vpop.xlane.xlu1 %387  ;;  %v430_v1 = vmul.f32 %v1699_v55, %v1699_v55  ;;  %v510_v49 = vsub.f32 %v1596_v51, %v1699_v55  ;;  %v902_v55 = vld [vmem:[%s1824_s4] ss:$0 sm:$0xff] }
 0x120   : > { %v372_v57 = vpop.xlane.xlu0 %371  ;;  %v421_v5 = vmul.f32 0.03125, %v388_v56 }
 0x121   : > { %v413_v6 = vmul.f32 0.03125, %v372_v57 }
 0x122   : > { %v1140_v3 = vpop.eup %1139  ;;  %v453_v61 = vsub.f32 %v421_v5, %v437_v59 }
 0x123   : > { %v445_v10 = vsub.f32 %v413_v6, %v429_v4  ;;  %v1142_v11 = vpop.eup %1141  ;;  %v390_v60 = vpop.xlane.xlu1 %389  ;;  %v531_v18 = vmul.f32 %v1140_v3, %v515_v7 }
 0x124   : > { %v374_v17 = vpop.xlane.xlu0 %373  ;;  %v469_v19 = vmax.f32 %v453_v61, 0.0  ;;  %v422_v40 = vmul.f32 0.03125, %v390_v60  ;;  %v523_v26 = vmul.f32 %v1142_v11, %v507_v14 }
 0x125   : > { %v461_v8 = vmax.f32 %v445_v10, 0.0  ;;  %v414_v25 = vmul.f32 0.03125, %v374_v17  ;;  %v554_v47 = vmul.f32 %v1636_v58, %v531_v18 }
 0x126   : > { %v1144_v21 = vpop.eup %1143  ;;  %v485_v9 = vadd.f32 1e-05, %v469_v19  ;;  %v454_v22 = vsub.f32 %v422_v40, %v438_v15  ;;  %v546_v27 = vmul.f32 %v1636_v58, %v523_v26 }
 0x127   : > { %v477_v41 = vadd.f32 1e-05, %v461_v8  ;;  %v446_v23 = vsub.f32 %v414_v25, %v430_v1  ;;  %v1146_v24 = vpop.eup %1145  ;;  %v577_v28 = vadd.f32 %v1647_v16, %v554_v47  ;;  %v532_v29 = vmul.f32 %v1144_v21, %v516_v44 }
 0x128   : > { %1147 = vrsqrt.f32 %v485_v9  ;;  %v470_v32 = vmax.f32 %v454_v22, 0.0  ;;  %v524_v52 = vmul.f32 %v1146_v24, %v508_v20  ;;  %v569_v31 = vadd.f32 %v1647_v16, %v546_v27 }
 0x129   : > { %v462_v30 = vmax.f32 %v446_v23, 0.0  ;;  %1149 = vrsqrt.f32 %v477_v41  ;;  %992 = vmatprep.mubr.f32.mxu1 %v577_v28  ;;  %v555_v53 = vmul.f32 %v1636_v58, %v532_v29 }
 0x12a   : > { %v486_v33 = vadd.f32 1e-05, %v470_v32  ;;  %v547_v63 = vmul.f32 %v1636_v58, %v524_v52  ;;  %980 = vmatprep.mubr.f32.mxu0 %v569_v31 }
 0x12b   : > { %v478_v2 = vadd.f32 1e-05, %v462_v30  ;;  %v578_v12 = vadd.f32 %v1647_v16, %v555_v53 }
 0x12c   : > { %1151 = vrsqrt.f32 %v486_v33  ;;  %v570_v42 = vadd.f32 %v1647_v16, %v547_v63 }
 0x12d   : > { %1153 = vrsqrt.f32 %v478_v2  ;;  %993 = vmatmul.mubr.f32.gmra.mrb[4].mxu1 %v578_v12 }
 0x12e   : > { %981 = vmatmul.mubr.f32.gmra.mrb[4].mxu0 %v570_v42 }
 0x132   : > { %v1148_v35 = vpop.eup %1147 }
 0x133   : > { %v1150_v37 = vpop.eup %1149  ;;  %v533_v38 = vmul.f32 %v1148_v35, %v517_v34 }
 0x134   : > { %v525_v13 = vmul.f32 %v1150_v37, %v509_v36 }
 0x135   : > { %v556_v0 = vmul.f32 %v1636_v58, %v533_v38 }
 0x136   : > { %v1152_v48 = vpop.eup %1151  ;;  %v548_v56 = vmul.f32 %v1636_v58, %v525_v13 }
 0x137   : > { %v1154_v57 = vpop.eup %1153  ;;  %v579_v45 = vadd.f32 %v1647_v16, %v556_v0  ;;  %v534_v62 = vmul.f32 %v1152_v48, %v518_v43 }
 0x138   : > { %v571_v46 = vadd.f32 %v1647_v16, %v548_v56  ;;  %v526_v39 = vmul.f32 %v1154_v57, %v510_v49 }
 0x139   : > { %995 = vmatprep.mubr.f32.mxu1 %v579_v45  ;;  %v557_v59 = vmul.f32 %v1636_v58, %v534_v62 }
 0x13a   : > { %983 = vmatprep.mubr.f32.mxu0 %v571_v46  ;;  %v549_v50 = vmul.f32 %v1636_v58, %v526_v39 }
 0x13b   : > { %v580_v54 = vadd.f32 %v1647_v16, %v557_v59 }
 0x13c   : > { %v572_v51 = vadd.f32 %v1647_v16, %v549_v50 }
 0x13d   : > { %996 = vmatmul.mubr.f32.gmra.mrb[6].mxu1 %v580_v54 }
 0x13e   : > { %984 = vmatmul.mubr.f32.gmra.mrb[6].mxu0 %v572_v51 }
 0x1e0   : > { %v988_v5 = vpop.f32.mrb[0].mxu1 }
 0x1e1   : > { %v976_v4 = vpop.f32.mrb[0].mxu0  ;;  %v716_v7 = vadd.f32 %v988_v5, %v902_v55  ;;  %v710_v61 = vpop.f32.mrb[1].mxu1 }
 0x1e2   : > { %v676_v6 = vadd.f32 %v976_v4, %v902_v55  ;;  %v670_v3 = vpop.f32.mrb[1].mxu0  ;;  %v711_v11 = vadd.f32 %v902_v55, %v710_v61 }
 0x1e3   : > { %v671_v10 = vadd.f32 %v902_v55, %v670_v3  ;;  %758 = vst [vmem:[%s1746_s11 + $0x48] sm:$0xff] %v716_v7 }
 0x1e4   : > { %750 = vst [vmem:[%s1746_s11 + $0x8] sm:$0xff] %v676_v6  ;;  %757 = vst [vmem:[%s1746_s11 + $0x40] sm:$0xff] %v711_v11 }
 0x1e5   : > { %749 = vst [vmem:[%s1746_s11] sm:$0xff] %v671_v10 }
 0x1f0   : > { %v991_v16 = vpop.f32.mrb[2].mxu1 }
 0x1f1   : > { %v979_v58 = vpop.f32.mrb[2].mxu0  ;;  %v726_v15 = vadd.f32 %v991_v16, %v902_v55  ;;  %v720_v60 = vpop.f32.mrb[3].mxu1 }
 0x1f2   : > { %v686_v14 = vadd.f32 %v979_v58, %v902_v55  ;;  %v680_v1 = vpop.f32.mrb[3].mxu0  ;;  %v721_v18 = vadd.f32 %v902_v55, %v720_v60 }
 0x1f3   : > { %v681_v17 = vadd.f32 %v902_v55, %v680_v1  ;;  %760 = vst [vmem:[%s1746_s11 + $0x58] sm:$0xff] %v726_v15 }
 0x1f4   : > { %752 = vst [vmem:[%s1746_s11 + $0x18] sm:$0xff] %v686_v14  ;;  %759 = vst [vmem:[%s1746_s11 + $0x50] sm:$0xff] %v721_v18 }
 0x1f5   : > { %751 = vst [vmem:[%s1746_s11 + $0x10] sm:$0xff] %v681_v17 }
 0x200   : > { %v994_v19 = vpop.f32.mrb[4].mxu1 }
 0x201   : > { %v982_v8 = vpop.f32.mrb[4].mxu0  ;;  %v736_v40 = vadd.f32 %v994_v19, %v902_v55  ;;  %v730_v25 = vpop.f32.mrb[5].mxu1 }
 0x202   : > { %v696_v44 = vadd.f32 %v982_v8, %v902_v55  ;;  %v690_v20 = vpop.f32.mrb[5].mxu0  ;;  %v731_v26 = vadd.f32 %v902_v55, %v730_v25 }
 0x203   : > { %762 = vst [vmem:[%s1746_s11 + $0x68] sm:$0xff] %v736_v40  ;;  %v691_v47 = vadd.f32 %v902_v55, %v690_v20 }
 0x204   : > { %754 = vst [vmem:[%s1746_s11 + $0x28] sm:$0xff] %v696_v44  ;;  %761 = vst [vmem:[%s1746_s11 + $0x60] sm:$0xff] %v731_v26 }
 0x205   : > { %753 = vst [vmem:[%s1746_s11 + $0x20] sm:$0xff] %v691_v47 }
 0x210   : > { %v997_v21 = vpop.f32.mrb[6].mxu1 }
 0x211   : > { %v985_v9 = vpop.f32.mrb[6].mxu0  ;;  %v746_v41 = vadd.f32 %v997_v21, %v902_v55  ;;  %v740_v22 = vpop.f32.mrb[7].mxu1 }
 0x212   : > { %v706_v23 = vadd.f32 %v985_v9, %v902_v55  ;;  %v700_v24 = vpop.f32.mrb[7].mxu0  ;;  %v741_v27 = vadd.f32 %v902_v55, %v740_v22 }
 0x213   : > { %764 = vst [vmem:[%s1746_s11 + $0x78] sm:$0xff] %v746_v41  ;;  %v701_v28 = vadd.f32 %v902_v55, %v700_v24 }
 0x214   : > { %756 = vst [vmem:[%s1746_s11 + $0x38] sm:$0xff] %v706_v23  ;;  %763 = vst [vmem:[%s1746_s11 + $0x70] sm:$0xff] %v741_v27 }
 0x215   : > { %755 = vst [vmem:[%s1746_s11 + $0x30] sm:$0xff] %v701_v28 }
 0x216   : > { %1226 = shalt.err (!%p1223_p5)
}
 0x217   : > { %s1227_s30 = scalar_lea.hbm %s1765_s27, 2048  ;;  %s1231_s10 = scalar_lea.hbm %s1825_s5, 4096 }
 0x218   : > { %p1228_p9 = scmp.ne.s32.totalorder %s1765_s27, %s1227_s30  ;;  %p1232_p3 = scmp.lt.u32.totalorder %s1765_s27, %s1825_s5 }
 0x219   : > { %p1233_p7 = scmp.lt.u32.totalorder %s1231_s10, %s1227_s30  ;;  %p1235_p4 = scmp.lt.u32.totalorder %s1227_s30, %s1765_s27 }
 0x21a   : > { %p1229_p1 = pnand %p1228_p9, %p1437_p10 }
 0x21b   : > { %p1234_p13 = por %p1233_p7, %p1232_p3 }
 0x21c   : > { %p1230_p2 = pneg %p1229_p1 }
 0x21d   : > { %p1236_p6 = por %p1235_p4, %p1234_p13 }
 0x21f   : > { %p1237_p8 = pnand %p1236_p6, %p1230_p2 }
 0x221   : > { %1240 = shalt.err (!%p1237_p8)
}
 0x222   : > { %s1306_s6 = smov 128   ;;  %s1307_s17 = smov 8  }
 0x223   : > { %1052 = dma.vmem_to_hbm [thread:$0]  (%p1437_p10), %s1767_s16, 2048, %s1765_s27, %s766_s21, %s1306_s6, %s1306_s6, %s1307_s17  }
 0x224 PF: > { %s795_s7 = sand.u32 1, %s1279_s18   ;;  %p1845_p12 = scmp.ne.s32.totalorder %s1834_s29, 0 }
 0x225   : > { %p1846_p11 = scmp.ge.s32.totalorder %s1299_s23, 2  ;;  %s796_s13 = scalar_lea.sflag [#allocation4], %s795_s7 }
 0x227   : > { %p1063_p0 = pnand %p1846_p11, %p1845_p12 }
 0x229   : > { %1274 = dma.done.wait (!%p1063_p0), %s796_s13, 2048  }
 0x22a   : > { %1276 = vsyncadd (!%p1063_p0), %s796_s13, 4294965248  ;;  %s22_s23 = sadd.s32 1, %s1299_s23   ;;  %s1847_s18 = smov %s1283_s19 }
 0x22b   : > { %p19_p5 = scmp.ge.s32.totalorder %s22_s23, 4   ;;  %s1848_s19 = smov %s1287_s20 }
 0x22c   : > { %s1849_s20 = smov %s1446_s15  ;;  %s1850_s21 = smov %s1295_s22 }
 0x22d   : > { %s1851_s22 = smov %s1853_s9  ;;  %21 = sbr.rel (!%p19_p5) target bundleno = 7 (0x7), region = 93 }
 0x234   :  { %801 = vsyncpa [#allocation3], 1 }
 0x235   :  { %803 = vsyncpa [#allocation3 + $0x1], 1 }
 0x236   :  { %804 = vsyncpa [#allocation6], 1 }
 0x237   :  { %805 = vsyncpa [#allocation4], 1 }
 0x238   :  { %807 = vsyncpa [#allocation4 + $0x1], 1 }

</bundles_post_ra>
